<compile_context>
chip_gen: v6e
topology: v6e:2x2x1
jax: 0.10.0
libtpu: 0.0.40
codegen_flags: <defaults>
</compile_context>

<pallas_src>
import math
import jax
import jax.numpy as jnp
from jax.experimental import pallas as pl
from jax.experimental.pallas import tpu as pltpu

_MIB = 1024 * 1024


def _round_up(x, m):
    return ((x + m - 1) // m) * m


def _vmem_capacity_bytes():
    try:
        return int(pltpu.get_tpu_info().vmem_capacity_bytes)
    except Exception:
        return 64 * _MIB  # conservative fallback (v7x per-TensorCore)


def _footprint_bytes(tm, tp, hid, out_bpe, use_scratch):
    """Estimated VMEM footprint: double-buffered tiles + optional f32 scratch."""
    per_buf = (tm * hid * 2            # x tile (bf16)
               + hid * tp * 2          # w1 chunk (bf16)
               + tp * 4                # b1 chunk (f32)
               + tp * hid * 2          # w2 chunk (bf16)
               + hid * 4               # b2 (f32)
               + tm * hid * out_bpe)   # out tile
    total = 2 * per_buf                # default double buffering per BlockSpec
    if use_scratch:
        total += tm * hid * 4          # f32 accumulator scratch
    return total


def _pff_kernel_f32out(x_ref, w1_ref, b1_ref, w2_ref, b2_ref, o_ref):
    """f32 output: accumulate directly into the (resident) output block."""
    k = pl.program_id(1)
    h = jnp.dot(x_ref[...], w1_ref[...], preferred_element_type=jnp.float32)
    h = jnp.maximum(h + b1_ref[...], 0.0)            # fc1 bias + ReLU in f32
    # dropout (eval mode) == identity
    p = jnp.dot(h.astype(w2_ref.dtype), w2_ref[...],
                preferred_element_type=jnp.float32)  # fc2 chunk (bf16 h, f32 acc)

    @pl.when(k == 0)
    def _():
        o_ref[...] = p                 # init with first product (no zero pass)

    @pl.when(k > 0)
    def _():
        o_ref[...] += p

    @pl.when(k == pl.num_programs(1) - 1)
    def _():
        o_ref[...] += b2_ref[...]


def _pff_kernel_scratch(x_ref, w1_ref, b1_ref, w2_ref, b2_ref, o_ref, acc_ref):
    """Non-f32 output: accumulate in an f32 VMEM scratch, downcast at the end."""
    k = pl.program_id(1)
    h = jnp.dot(x_ref[...], w1_ref[...], preferred_element_type=jnp.float32)
    h = jnp.maximum(h + b1_ref[...], 0.0)
    p = jnp.dot(h.astype(w2_ref.dtype), w2_ref[...],
                preferred_element_type=jnp.float32)

    @pl.when(k == 0)
    def _():
        acc_ref[...] = p

    @pl.when(k > 0)
    def _():
        acc_ref[...] += p

    @pl.when(k == pl.num_programs(1) - 1)
    def _():
        o_ref[...] = (acc_ref[...] + b2_ref[...]).astype(o_ref.dtype)


def pointwise_ffn(x, w1, b1, w2, b2, *, max_pff_tile=None):
    """x: [batch, seq, hid] -> [batch, seq, hid]   (fc2(relu(fc1(x))), dropout=eval).

    max_pff_tile is a test-only knob that forces the streamed (multi-step
    reduction) path; leave as None in normal use.
    """
    batch, seq, hid = x.shape
    pff = w1.shape[1]
    M = batch * seq
    out_dtype = x.dtype
    out_bpe = jnp.dtype(out_dtype).itemsize
    use_scratch = jnp.dtype(out_dtype) != jnp.dtype(jnp.float32)

    # ---- pff padding to a 256 multiple (exactness argued above) --------------
    pff_p = _round_up(pff, 256)

    # ---- generation-aware VMEM budget ----------------------------------------
    vmem_cap = _vmem_capacity_bytes()
    budget = max(32 * _MIB, vmem_cap - 8 * _MIB)

    def fits(tm, tp):
        return _footprint_bytes(tm, tp, hid, out_bpe, use_scratch) <= budget

    def pick_tm(target):
        tm = min(target, _round_up(M, 16))       # >=16 rows for bf16 packing
        if tm >= 128:
            tm = _round_up(tm, 128)              # 128/256-aligned MXU row tile
        return tm

    # ---- tile selection -------------------------------------------------------
    forced = max_pff_tile is not None
    # 1) weights-resident fast path: tp == pff_p  ->  grid (Mi, 1); weight block
    #    indices are constant so w1/w2 are DMA'd once for the whole kernel.
    tm_eff = pick_tm(256)
    tp_eff = pff_p
    if forced or not fits(tm_eff, tp_eff):
        # 2) streamed-weights path: large M tile (intensity vs weight bytes == tm).
        tm_eff = pick_tm(512)
        if forced:
            tp_eff = max(128, (min(max_pff_tile, pff_p) // 128) * 128)
            while pff_p % tp_eff != 0:           # 128-multiple dividing pff_p
                tp_eff -= 128
        elif pff_p % 512 == 0 and fits(tm_eff, 512):
            tp_eff = 512
        else:
            tp_eff = 256                         # always divides pff_p
        while not fits(tm_eff, tp_eff) and tm_eff > 16:
            tm_eff = max(16, _round_up(tm_eff // 2, 16))

    Mp = _round_up(M, tm_eff)

    # ---- operands (bf16 MXU inputs, f32 biases), zero-padded ------------------
    x2 = x.reshape(M, hid).astype(jnp.bfloat16)
    if Mp != M:
        x2 = jnp.pad(x2, ((0, Mp - M), (0, 0)))
    w1b = w1.astype(jnp.bfloat16)
    w2b = w2.astype(jnp.bfloat16)
    b1f = b1.astype(jnp.float32)
    if pff_p != pff:
        w1b = jnp.pad(w1b, ((0, 0), (0, pff_p - pff)))
        b1f = jnp.pad(b1f, ((0, pff_p - pff),))
        w2b = jnp.pad(w2b, ((0, pff_p - pff), (0, 0)))
    b1_2 = b1f.reshape(1, pff_p)
    b2_2 = b2.reshape(1, hid).astype(jnp.float32)

    # ---- VMEM limit: actual footprint + slack, capped at physical - headroom --
    fp = _footprint_bytes(tm_eff, tp_eff, hid, out_bpe, use_scratch)
    vmem_limit = int(min(budget, max(32 * _MIB, fp + 8 * _MIB)))

    grid = (Mp // tm_eff, pff_p // tp_eff)
    kernel = _pff_kernel_scratch if use_scratch else _pff_kernel_f32out
    scratch = [pltpu.VMEM((tm_eff, hid), jnp.float32)] if use_scratch else []

    out2 = pl.pallas_call(
        kernel,
        out_shape=jax.ShapeDtypeStruct((Mp, hid), out_dtype),
        grid=grid,
        in_specs=[
            pl.BlockSpec((tm_eff, hid), lambda i, k: (i, 0)),    # x tile
            pl.BlockSpec((hid, tp_eff), lambda i, k: (0, k)),    # w1 chunk
            pl.BlockSpec((1, tp_eff), lambda i, k: (0, k)),      # b1 chunk
            pl.BlockSpec((tp_eff, hid), lambda i, k: (k, 0)),    # w2 chunk
            pl.BlockSpec((1, hid), lambda i, k: (0, 0)),         # b2 (resident)
        ],
        out_specs=pl.BlockSpec((tm_eff, hid), lambda i, k: (i, 0)),
        scratch_shapes=scratch,
        compiler_params=pltpu.CompilerParams(
            dimension_semantics=("parallel", "arbitrary"),
            vmem_limit_bytes=vmem_limit,
        ),
    )(x2, w1b, b1_2, w2b, b2_2)

    return out2[:M].reshape(batch, seq, hid)


def _init_linear(key, fan_in, fan_out, dtype=jnp.float32):
    """Deterministic init matching nn.Linear's kaiming-uniform convention."""
    kw, kb = jax.random.split(key)
    bound = 1.0 / math.sqrt(fan_in)
    # store weight as [in, out] so the kernel can do x @ w directly
    w = jax.random.uniform(kw, (fan_in, fan_out), dtype, -bound, bound)
    b = jax.random.uniform(kb, (fan_out,), dtype, -bound, bound)
    return w, b


if __name__ == "__main__":
    hid_dim, pff_dim, pff_drop_out = 32, 64, 0.1
    batch, seq = 2, 8

    key = jax.random.PRNGKey(0)
    kx, k1, k2 = jax.random.split(key, 3)

    x = jax.random.normal(kx, (batch, seq, hid_dim), jnp.float32)
    w1, b1 = _init_linear(k1, hid_dim, pff_dim)
    w2, b2 = _init_linear(k2, pff_dim, hid_dim)

    # pure-JAX f32 reference (dropout in eval mode == identity)
    ref = jnp.maximum(x @ w1 + b1, 0.0) @ w2 + b2

    # 1) default: weights-resident path, single reduction step, f32 in-place acc
    out = jax.block_until_ready(pointwise_ffn(x, w1, b1, w2, b2))
    assert out.shape == (batch, seq, hid_dim)
    assert jnp.allclose(out, ref, atol=5e-2, rtol=5e-2), "mismatch (resident path)"

    # 2) forced streamed path: exercises the multi-step pff reduction / pl.when
    out_s = jax.block_until_ready(
        pointwise_ffn(x, w1, b1, w2, b2, max_pff_tile=128))
    assert jnp.allclose(out_s, ref, atol=5e-2, rtol=5e-2), "mismatch (streamed path)"

    # 3) bf16 activations/output: exercises the f32-scratch accumulator kernel
    out_bf = jax.block_until_ready(
        pointwise_ffn(x.astype(jnp.bfloat16), w1, b1, w2, b2))
    assert jnp.allclose(out_bf.astype(jnp.float32), ref, atol=1e-1, rtol=1e-1), \
        "mismatch (bf16 path)"

    print("KERNEL_OK")
</pallas_src>

<mosaic_0001>
module attributes {stable_mosaic.version = 11 : i64} {
  func.func @_pff_kernel_f32out(%arg0: i32, %arg1: i32, %arg2: memref<16x32xbf16, #tpu.memory_space<vmem>>, %arg3: memref<32x256xbf16, #tpu.memory_space<vmem>>, %arg4: memref<1x256xf32, #tpu.memory_space<vmem>>, %arg5: memref<256x32xbf16, #tpu.memory_space<vmem>>, %arg6: memref<1x32xf32, #tpu.memory_space<vmem>>, %arg7: memref<16x32xf32, #tpu.memory_space<vmem>>) attributes {dimension_semantics = [#tpu.dimension_semantics<parallel>, #tpu.dimension_semantics<arbitrary>], iteration_bounds = array<i64: 1, 1>, scalar_prefetch = 0 : i64, scratch_operands = 0 : i64, tpu.core_type = #tpu.core_type<tc>, window_params = [{transform_indices = @transform_0, window_bounds = array<i64: 16, 32>}, {transform_indices = @transform_1, window_bounds = array<i64: 32, 256>}, {transform_indices = @transform_2, window_bounds = array<i64: 1, 256>}, {transform_indices = @transform_3, window_bounds = array<i64: 256, 32>}, {pipeline_mode = #tpu.pipeline_mode<synchronous>, transform_indices = @transform_4, window_bounds = array<i64: 1, 32>}, {transform_indices = @transform_5, window_bounds = array<i64: 16, 32>}]} {
    %c0 = arith.constant 0 : index
    %c0_0 = arith.constant 0 : index
    %0 = vector.load %arg2[%c0, %c0_0] : memref<16x32xbf16, #tpu.memory_space<vmem>>, vector<16x32xbf16>
    %c0_1 = arith.constant 0 : index
    %c0_2 = arith.constant 0 : index
    %1 = vector.load %arg3[%c0_1, %c0_2] : memref<32x256xbf16, #tpu.memory_space<vmem>>, vector<32x256xbf16>
    %cst = arith.constant dense<0.000000e+00> : vector<16x256xf32>
    %2 = tpu.matmul %0, %1, %cst {dimension_numbers = #tpu.dot_dimension_numbers<[1], [0], [0], [1], [0, 0, 1, 1], [], []>} : vector<16x32xbf16>, vector<32x256xbf16>, vector<16x256xf32> -> vector<16x256xf32>
    %c0_3 = arith.constant 0 : index
    %c0_4 = arith.constant 0 : index
    %3 = vector.load %arg4[%c0_3, %c0_4] : memref<1x256xf32, #tpu.memory_space<vmem>>, vector<1x256xf32>
    %4 = vector.broadcast %3 : vector<1x256xf32> to vector<16x256xf32>
    %5 = arith.addf %2, %4 : vector<16x256xf32>
    %cst_5 = arith.constant 0.000000e+00 : f32
    %6 = vector.broadcast %cst_5 : f32 to vector<16x256xf32>
    %7 = arith.maximumf %5, %6 : vector<16x256xf32>
    %8 = arith.truncf %7 : vector<16x256xf32> to vector<16x256xbf16>
    %c0_6 = arith.constant 0 : index
    %c0_7 = arith.constant 0 : index
    %9 = vector.load %arg5[%c0_6, %c0_7] : memref<256x32xbf16, #tpu.memory_space<vmem>>, vector<256x32xbf16>
    %cst_8 = arith.constant dense<0.000000e+00> : vector<16x32xf32>
    %10 = tpu.matmul %8, %9, %cst_8 {dimension_numbers = #tpu.dot_dimension_numbers<[1], [0], [0], [1], [0, 0, 1, 1], [], []>} : vector<16x256xbf16>, vector<256x32xbf16>, vector<16x32xf32> -> vector<16x32xf32>
    %c0_i32 = arith.constant 0 : i32
    %11 = arith.cmpi eq, %arg1, %c0_i32 : i32
    %12 = arith.extui %11 : i1 to i32
    %c0_i32_9 = arith.constant 0 : i32
    %13 = arith.cmpi ne, %12, %c0_i32_9 : i32
    scf.if %13 {
      %c0_14 = arith.constant 0 : index
      %c0_15 = arith.constant 0 : index
      %20 = vector.load %arg7[%c0_14, %c0_15] : memref<16x32xf32, #tpu.memory_space<vmem>>, vector<16x32xf32>
      tpu.vector_store %arg7[%c0_14, %c0_15], %10 {strides = array<i32>} : memref<16x32xf32, #tpu.memory_space<vmem>>, vector<16x32xf32>,
    } else {
    }
    %c0_i32_10 = arith.constant 0 : i32
    %14 = arith.cmpi sgt, %arg1, %c0_i32_10 : i32
    %15 = arith.extui %14 : i1 to i32
    %c0_i32_11 = arith.constant 0 : i32
    %16 = arith.cmpi ne, %15, %c0_i32_11 : i32
    scf.if %16 {
      %c0_14 = arith.constant 0 : index
      %c0_15 = arith.constant 0 : index
      %20 = vector.load %arg7[%c0_14, %c0_15] : memref<16x32xf32, #tpu.memory_space<vmem>>, vector<16x32xf32>
      %21 = arith.addf %20, %10 : vector<16x32xf32>
      %c0_16 = arith.constant 0 : index
      %c0_17 = arith.constant 0 : index
      %22 = vector.load %arg7[%c0_16, %c0_17] : memref<16x32xf32, #tpu.memory_space<vmem>>, vector<16x32xf32>
      tpu.vector_store %arg7[%c0_16, %c0_17], %21 {strides = array<i32>} : memref<16x32xf32, #tpu.memory_space<vmem>>, vector<16x32xf32>,
    } else {
    }
    %c0_i32_12 = arith.constant 0 : i32
    %17 = arith.cmpi eq, %arg1, %c0_i32_12 : i32
    %18 = arith.extui %17 : i1 to i32
    %c0_i32_13 = arith.constant 0 : i32
    %19 = arith.cmpi ne, %18, %c0_i32_13 : i32
    scf.if %19 {
      %c0_14 = arith.constant 0 : index
      %c0_15 = arith.constant 0 : index
      %20 = vector.load %arg7[%c0_14, %c0_15] : memref<16x32xf32, #tpu.memory_space<vmem>>, vector<16x32xf32>
      %c0_16 = arith.constant 0 : index
      %c0_17 = arith.constant 0 : index
      %21 = vector.load %arg6[%c0_16, %c0_17] : memref<1x32xf32, #tpu.memory_space<vmem>>, vector<1x32xf32>
      %22 = vector.broadcast %21 : vector<1x32xf32> to vector<16x32xf32>
      %23 = arith.addf %20, %22 : vector<16x32xf32>
      %c0_18 = arith.constant 0 : index
      %c0_19 = arith.constant 0 : index
      %24 = vector.load %arg7[%c0_18, %c0_19] : memref<16x32xf32, #tpu.memory_space<vmem>>, vector<16x32xf32>
      tpu.vector_store %arg7[%c0_18, %c0_19], %23 {strides = array<i32>} : memref<16x32xf32, #tpu.memory_space<vmem>>, vector<16x32xf32>,
    } else {
    }
    return
  }
  func.func @transform_0(%arg0: i32, %arg1: i32) -> (i32, i32) {
    %c0_i32 = arith.constant 0 : i32
    %c0_i32_0 = arith.constant 0 : i32
    return %arg0, %c0_i32 : i32, i32
  }
  func.func @transform_1(%arg0: i32, %arg1: i32) -> (i32, i32) {
    %c0_i32 = arith.constant 0 : i32
    %c0_i32_0 = arith.constant 0 : i32
    return %c0_i32, %arg1 : i32, i32
  }
  func.func @transform_2(%arg0: i32, %arg1: i32) -> (i32, i32) {
    %c0_i32 = arith.constant 0 : i32
    %c0_i32_0 = arith.constant 0 : i32
    return %c0_i32, %arg1 : i32, i32
  }
  func.func @transform_3(%arg0: i32, %arg1: i32) -> (i32, i32) {
    %c0_i32 = arith.constant 0 : i32
    %c0_i32_0 = arith.constant 0 : i32
    return %arg1, %c0_i32 : i32, i32
  }
  func.func @transform_4(%arg0: i32, %arg1: i32) -> (i32, i32) {
    %c0_i32 = arith.constant 0 : i32
    %c0_i32_0 = arith.constant 0 : i32
    %c0_i32_1 = arith.constant 0 : i32
    return %c0_i32, %c0_i32_0 : i32, i32
  }
  func.func @transform_5(%arg0: i32, %arg1: i32) -> (i32, i32) {
    %c0_i32 = arith.constant 0 : i32
    %c0_i32_0 = arith.constant 0 : i32
    return %arg0, %c0_i32 : i32, i32
  }
}

</mosaic_0001>

<bundles_post_ra>
// kernel: tpu_custom_call.1
= control target key start
LH: loop header
LB: loop body
LE: loop exit
PB: predicated region body
PF: predicated region fallthrough
CT: control target
= control target key end

     0   :  { %v429_v2 = vmov 0   ;;  %vm65_vm0 = vcmask 261120   ;;  %s540_s0 = inlined_call_operand.vmem [shape: bf16[16,32], index: 0, kind: input, shape index: {}]   ;;  %s541_s1 = inlined_call_operand.vmem [shape: bf16[32,256], index: 1, kind: input, shape index: {}]   ;;  %s542_s2 = inlined_call_operand.vmem [shape: f32[1,256], index: 2, kind: input, shape index: {}]   ;;  %s543_s3 = inlined_call_operand.vmem [shape: bf16[256,32], index: 3, kind: input, shape index: {}]   ;;  %s544_s4 = inlined_call_operand.vmem [shape: f32[1,32], index: 4, kind: input, shape index: {}]   ;;  %s545_s5 = inlined_call_operand.hbm [shape: f32[16,32], index: 5, kind: output, shape index: {}]  }
   0x1   :  { %v384_v0 = vld [vmem:[%s541_s1 + $0x14] ss:$8 sps:$4 sm:$0xff]   ;;  %v386_v1 = vld [vmem:[%s541_s1 + $0x10] ss:$8 sps:$4 sm:$0xff]   ;;  %101 = vmatprep.mubr.bf16.mxu0 %v429_v2  ;;  %v387_v3 = vld [vmem:[%s541_s1 + $0x4] ss:$8 sps:$4 sm:$0xff]  }
   0x2   :  { %81 = vmatprep.subr.bf16.mxu0 %v384_v0  ;;  %v389_v4 = vld [vmem:[%s541_s1] ss:$8 sps:$4 sm:$0xff]   ;;  %v391_v6 = vld [vmem:[%s543_s3 + $0x78] sm:$0xff]   ;;  %v393_v8 = vld [vmem:[%s543_s3 + $0x70] sm:$0xff]  }
   0x3   :  { %82 = vmatpush1.bf16.msra.mxu0 %v386_v1  ;;  %v390_v5 = vld [vmem:[%s540_s0] sm:$0xff]   ;;  %v392_v7 = vld [vmem:[%s543_s3 + $0x38] sm:$0xff]   ;;  %358 = vmatprep.subr.bf16.mxu1 %v391_v6  ;;  %v394_v9 = vld [vmem:[%s543_s3 + $0x30] sm:$0xff]  }
   0x4   :  { %83 = vmatprep.subr.bf16.mxu0 %v387_v3  ;;  %359 = vmatpush3.bf16.msra.mxu1 %v392_v7  ;;  %v395_v10 = vld [vmem:[%s543_s3 + $0x68] sm:$0xff]   ;;  %v397_v12 = vld [vmem:[%s543_s3 + $0x60] sm:$0xff]   ;;  %v399_v14 = vld [vmem:[%s543_s3 + $0x58] sm:$0xff]  }
   0x5   :  { %360 = vmatprep.subr.bf16.mxu1 %v393_v8  ;;  %v396_v11 = vld [vmem:[%s543_s3 + $0x28] sm:$0xff]   ;;  %v398_v13 = vld [vmem:[%s543_s3 + $0x20] sm:$0xff]  }
   0x7   :  { %84 = vmatpush1.bf16.msra.mxu0 %v389_v4 }
   0x8   :  { %361 = vmatpush3.bf16.msra.mxu1 %v394_v9 }
   0x9   :  { %362 = vmatprep.subr.bf16.mxu1 %v395_v10 }
   0xa   :  { %340 = vmatmul.mubr.msk.bf16.vlgmr.msra.gmra.mxu0 %vm65_vm0, %v390_v5 }
   0xc   :  { %363 = vmatpush3.bf16.msra.mxu1 %v396_v11 }
   0xd   :  { %364 = vmatprep.subr.bf16.mxu1 %v397_v12 }
   0xe   :  { %10 = vsyncpa [#allocation3], 0  ;;  %v400_v15 = vld [vmem:[%s543_s3 + $0x18] sm:$0xff]   ;;  %v401_v16 = vld [vmem:[%s543_s3 + $0x50] sm:$0xff]   ;;  %v30_v22 = vlaneseq  ;;  %s430_s9 = smov [#allocation2]  }
   0xf   :  { %v402_v17 = vld [vmem:[%s543_s3 + $0x10] sm:$0xff]   ;;  %v403_v18 = vld [vmem:[%s543_s3 + $0x48] sm:$0xff]   ;;  %v405_v20 = vld [vmem:[%s543_s3 + $0x40] sm:$0xff]   ;;  %s324_s0 = sshll.u32 %s430_s9, 4  ;;  %s325_s0 = int_to_ptr.vmem [resolvable:$true] %s324_s0 }
  0x10   :  { %365 = vmatpush3.bf16.msra.mxu1 %v398_v13  ;;  %v404_v19 = vld [vmem:[%s543_s3 + $0x8] sm:$0xff]   ;;  %v406_v21 = vld [vmem:[%s543_s3] sm:$0xff]   ;;  %v31_v23 = vshrl.u32 %v30_v22, 7  ;;  %s407_s10 = scalar_lea.vmem %s325_s0, 256  ;;  %p412_p1 = scmp.lt.s32.totalorder %s325_s0, %s325_s0 }
  0x11   :  { %366 = vmatprep.subr.bf16.mxu1 %v399_v14  ;;  %v28_v26 = vld [vmem:[%s542_s2] sm:$0x3]  ;;  %p408_p0 = scmp.ne.s32.totalorder %s325_s0, %s407_s10  ;;  %p413_p2 = scmp.lt.s32.totalorder %s407_s10, %s407_s10 }
  0x12   :  { %v36_v24 = vsub.s32 1, %v31_v23  ;;  %v32_v25 = vsub.s32 0, %v31_v23  ;;  %v357_v49 = vld [vmem:[%s544_s4] ss:$0 sm:$0xff] }
  0x13   :  { %p414_p3 = por %p413_p2, %p412_p1 }
  0x14   :  { %367 = vmatpush3.bf16.msra.mxu1 %v400_v15  ;;  %v37_v28 = vrot.slane %v28_v26, %v36_v24  ;;  %v33_v29 = vrot.slane %v28_v26, %v32_v25 }
  0x15   :  { %368 = vmatprep.subr.bf16.mxu1 %v401_v16  ;;  %p415_p4 = pnand %p414_p3, %p408_p0 }
  0x18   :  { %369 = vmatpush3.bf16.msra.mxu1 %v402_v17 }
  0x19   :  { %370 = vmatprep.subr.bf16.mxu1 %v403_v18 }
  0x1c   :  { %371 = vmatpush3.bf16.msra.mxu1 %v404_v19 }
  0x1d   :  { %372 = vmatprep.subr.bf16.mxu1 %v405_v20 }
  0x20   :  { %373 = vmatpush3.bf16.msra.mxu1 %v406_v21 }
  0xca   :  { %v103_v27 = vpop.f32.mrf.mxu0 }
  0xcb   :  { %v104_v34 = vadd.f32 %v103_v27, %v33_v29 }
  0xcc   :  { %v105_v30 = vpop.f32.mrf.mxu0 }
  0xcd   :  { %v106_v32 = vadd.f32 %v105_v30, %v37_v28  ;;  %v112_v40 = vmax.f32 %v104_v34, 0.0 }
  0xce   :  { %v107_v31 = vpop.f32.mrf.mxu0 }
  0xcf   :  { %v108_v33 = vadd.f32 %v107_v31, %v33_v29  ;;  %v113_v38 = vmax.f32 %v106_v32, 0.0 }
  0xd0   :  { %v109_v35 = vpop.f32.mrf.mxu0 }
  0xd1   :  { %v110_v36 = vadd.f32 %v109_v35, %v37_v28  ;;  %v114_v37 = vmax.f32 %v108_v33, 0.0 }
  0xd3   :  { %v115_v39 = vmax.f32 %v110_v36, 0.0  ;;  %v116_v42 = vpack.c.bf16 %v114_v37, %v112_v40 }
  0xd5   :  { %v117_v41 = vpack.c.bf16 %v115_v39, %v113_v38 }
  0xd7   :  { %278 = vmatprep.mubr.bf16.mxu1 %v117_v41 }
  0xd8   :  { %279 = vmatmul.mubr.bf16.vlgmr.msra.gmra.mxu1 %v116_v42 }
 0x198   :  { %v374_v43 = vpop.f32.mrf.mxu1 }
 0x19a   :  { %v375_v44 = vpop.f32.mrf.mxu1 }
 0x19b   :  { %v376_v45 = vadd.f32 %v375_v44, %v374_v43 }
 0x19c   :  { %v377_v46 = vpop.f32.mrf.mxu1 }
 0x19d   :  { %291 = vst.msk [vmem:[#allocation2] sm:$0xff] %vm65_vm0, %v376_v45 }
 0x19e   :  { %v378_v47 = vpop.f32.mrf.mxu1 }
 0x19f   :  { %v379_v48 = vadd.f32 %v378_v47, %v377_v46 }
 0x1a1   :  { %292 = vst.msk [vmem:[#allocation2 + $0x8] sm:$0xff] %vm65_vm0, %v379_v48 }
 0x1a4   :  { %v306_v50 = vld [vmem:[#allocation2] sm:$0xff] }
 0x1a5   :  { %v315_v51 = vadd.f32 %v357_v49, %v306_v50 }
 0x1a7   :  { %317 = vst.msk [vmem:[#allocation2] sm:$0xff] %vm65_vm0, %v315_v51 }
 0x1a8   :  { %v307_v52 = vld [vmem:[#allocation2 + $0x8] sm:$0xff] }
 0x1a9   :  { %v316_v53 = vadd.f32 %v357_v49, %v307_v52 }
 0x1ab   :  { %318 = vst.msk [vmem:[#allocation2 + $0x8] sm:$0xff] %vm65_vm0, %v316_v53 }
 0x1ac   :  { %418 = shalt.err (!%p415_p4)
}
 0x1ad   :  { %s431_s11 = smov 128   ;;  %s432_s4 = smov 8  }
 0x1ae   :  { %330 = dma.vmem_to_hbm [thread:$0]  %s325_s0, 256, %s545_s5, [#allocation3], %s431_s11, %s431_s11, %s432_s4  }
 0x1af   :  { %427 = dma.done.wait [#allocation3], 256  }
 0x1b0   :  { %428 = vsyncadd [#allocation3], 4294967040 }
 0x1b1   :  { %334 = vsyncpa [#allocation3], 1 }

</bundles_post_ra>
